<compile_context>
chip_gen: v7x
topology: tpu7x:2x2x1
jax: 0.10.0
libtpu: 0.0.40
codegen_flags: <defaults>
</compile_context>

<pallas_src>
import functools

import jax
import jax.numpy as jnp
from jax import lax
from jax.experimental import pallas as pl
from jax.experimental.pallas import tpu as pltpu

_HALF_LOG_2PI = 0.5 * float(jnp.log(2.0 * jnp.pi))


def _nll_partial_kernel(logits_ref, mu_ref, sigma_ref, y_ref, out_ref, *,
                        n_valid, tile_n):
    """One batch tile: out_ref[...] <- sum_n log p(y_n) for this tile (splatted)."""
    i = pl.program_id(0)

    logits = logits_ref[...].astype(jnp.float32)   # (K, TILE_N) mixture logits
    mu = mu_ref[...].astype(jnp.float32)           # (K, TILE_N)
    sigma = sigma_ref[...].astype(jnp.float32)     # (K, TILE_N)
    y = y_ref[...].astype(jnp.float32)             # (1, TILE_N) -> bcast over K

    # Normal(mu, sigma).log_prob(y); reciprocal goes to the EUP slot,
    # the multiply co-issues on a VALU slot.  (approx=True if tolerance allows)
    inv_sigma = pl.reciprocal(sigma, approx=False)
    z = (y - mu) * inv_sigma
    comp_logp = -0.5 * (z * z) - jnp.log(sigma) - _HALF_LOG_2PI   # (K, TILE_N)

    # Mixture log_prob with the log-softmax folded in:
    #   log p(y) = lse_k(logits_k + comp_k) - lse_k(logits_k)
    w = logits + comp_logp
    wmax = jnp.max(w, axis=0, keepdims=True)
    lse_w = wmax + jnp.log(jnp.sum(jnp.exp(w - wmax), axis=0, keepdims=True))
    lmax = jnp.max(logits, axis=0, keepdims=True)
    lse_l = lmax + jnp.log(jnp.sum(jnp.exp(logits - lmax), axis=0, keepdims=True))
    log_prob = lse_w - lse_l                        # (1, TILE_N)

    # Mask out padded samples of the (possibly partial) last tile.
    col = i * tile_n + lax.broadcasted_iota(jnp.int32, log_prob.shape, 1)
    log_prob = jnp.where(col < n_valid, log_prob, 0.0)

    tile_sum = jnp.sum(log_prob)
    out_ref[...] = jnp.broadcast_to(tile_sum, out_ref.shape).astype(jnp.float32)


def mdn_nll_loss_kn(logits_kn, mu_kn, sigma_kn, y_true, *, tile_n=8192):
    """NLL for inputs already in the lane-dense (K, N) layout."""
    k, n = logits_kn.shape
    assert mu_kn.shape == (k, n) and sigma_kn.shape == (k, n)
    y2 = y_true.reshape(1, n)

    if n <= tile_n:
        tile_n = n              # single block spanning the full batch dim
    else:
        assert tile_n % 128 == 0, "tile_n must be a multiple of 128"
    num_tiles = pl.cdiv(n, tile_n)

    kernel = functools.partial(_nll_partial_kernel, n_valid=n, tile_n=tile_n)
    partials = pl.pallas_call(
        kernel,
        out_shape=jax.ShapeDtypeStruct((num_tiles, 1, 128), jnp.float32),
        grid_spec=pltpu.PrefetchScalarGridSpec(
            num_scalar_prefetch=0,
            grid=(num_tiles,),
            in_specs=[
                pl.BlockSpec((k, tile_n), lambda i: (0, i)),
                pl.BlockSpec((k, tile_n), lambda i: (0, i)),
                pl.BlockSpec((k, tile_n), lambda i: (0, i)),
                pl.BlockSpec((1, tile_n), lambda i: (0, i)),
            ],
            out_specs=pl.BlockSpec((1, 1, 128), lambda i: (i, 0, 0)),
        ),
        compiler_params=pltpu.CompilerParams(
            dimension_semantics=("parallel",)),
    )(logits_kn, mu_kn, sigma_kn, y2)

    # Each output row holds one tile's partial sum splatted across 128 lanes.
    return -(jnp.sum(partials[:, 0, 0]) / n)


def mdn_nll_loss(logits_pi, mu, sigma, y_true, *, tile_n=8192):
    """-mean_n log( sum_k softmax(logits_pi)_nk * Normal(mu_nk, sigma_nk).pdf(y_n) ).

    Accepts the natural MDN layout (N, K).  The wrapper transposes to the
    lane-dense (K, N) layout the kernel wants; callers that can produce (K, N)
    directly should use `mdn_nll_loss_kn` to skip the transpose.
    """
    n, k = logits_pi.shape
    return mdn_nll_loss_kn(logits_pi.T, mu.T, sigma.T,
                           y_true.reshape(n), tile_n=tile_n)


def mdn_nll_loss_ref(logits_pi, mu, sigma, y_true):
    y = y_true.reshape(-1, 1).astype(jnp.float32)
    log_pi = jax.nn.log_softmax(logits_pi.astype(jnp.float32), axis=-1)
    z = (y - mu) / sigma
    comp_logp = -0.5 * z * z - jnp.log(sigma) - _HALF_LOG_2PI
    log_prob = jax.scipy.special.logsumexp(log_pi + comp_logp, axis=-1)
    return -jnp.mean(log_prob)


if __name__ == "__main__":
    key = jax.random.PRNGKey(0)
    k1, k2, k3, k4 = jax.random.split(key, 4)

    N, K = 300, 8   # non-multiple of 128 -> exercises the masked tail tile
    logits_pi = jax.random.normal(k1, (N, K), dtype=jnp.float32)
    mu = jax.random.normal(k2, (N, K), dtype=jnp.float32)
    sigma = jax.nn.softplus(jax.random.normal(k3, (N, K), dtype=jnp.float32)) + 1e-3
    y_true = jax.random.normal(k4, (N,), dtype=jnp.float32)

    ref = mdn_nll_loss_ref(logits_pi, mu, sigma, y_true)

    # multi-tile path (grid=2, partial last tile masked in-kernel)
    loss_tiled = mdn_nll_loss(logits_pi, mu, sigma, y_true, tile_n=256)
    jax.block_until_ready(loss_tiled)
    assert jnp.allclose(loss_tiled, ref, rtol=1e-5, atol=1e-5), (loss_tiled, ref)

    # single-tile path (default tile; block spans the full batch dim)
    loss_single = mdn_nll_loss(logits_pi, mu, sigma, y_true)
    jax.block_until_ready(loss_single)
    assert jnp.allclose(loss_single, ref, rtol=1e-5, atol=1e-5), (loss_single, ref)

    print("KERNEL_OK")
</pallas_src>

<mosaic_0001>
module attributes {stable_mosaic.version = 11 : i64} {
  func.func @_nll_partial_kernel(%arg0: i32, %arg1: memref<8x256xf32, #tpu.memory_space<vmem>>, %arg2: memref<8x256xf32, #tpu.memory_space<vmem>>, %arg3: memref<8x256xf32, #tpu.memory_space<vmem>>, %arg4: memref<1x256xf32, #tpu.memory_space<vmem>>, %arg5: memref<1x1x128xf32, #tpu.memory_space<vmem>>) attributes {dimension_semantics = [#tpu.dimension_semantics<parallel>], iteration_bounds = array<i64: 2>, scalar_prefetch = 0 : i64, scratch_operands = 0 : i64, tpu.core_type = #tpu.core_type<tc>, window_params = [{transform_indices = @transform_0, window_bounds = array<i64: 8, 256>}, {transform_indices = @transform_1, window_bounds = array<i64: 8, 256>}, {transform_indices = @transform_2, window_bounds = array<i64: 8, 256>}, {transform_indices = @transform_3, window_bounds = array<i64: 1, 256>}, {transform_indices = @transform_4, window_bounds = array<i64: 1, 1, 128>}]} {
    %c0 = arith.constant 0 : index
    %c0_0 = arith.constant 0 : index
    %0 = vector.load %arg1[%c0, %c0_0] : memref<8x256xf32, #tpu.memory_space<vmem>>, vector<8x256xf32>
    %c0_1 = arith.constant 0 : index
    %c0_2 = arith.constant 0 : index
    %1 = vector.load %arg2[%c0_1, %c0_2] : memref<8x256xf32, #tpu.memory_space<vmem>>, vector<8x256xf32>
    %c0_3 = arith.constant 0 : index
    %c0_4 = arith.constant 0 : index
    %2 = vector.load %arg3[%c0_3, %c0_4] : memref<8x256xf32, #tpu.memory_space<vmem>>, vector<8x256xf32>
    %c0_5 = arith.constant 0 : index
    %c0_6 = arith.constant 0 : index
    %3 = vector.load %arg4[%c0_5, %c0_6] : memref<1x256xf32, #tpu.memory_space<vmem>>, vector<1x256xf32>
    %4 = tpu.reciprocal %2 : vector<8x256xf32> -> vector<8x256xf32>
    %5 = vector.broadcast %3 : vector<1x256xf32> to vector<8x256xf32>
    %6 = arith.subf %5, %1 : vector<8x256xf32>
    %7 = arith.mulf %6, %4 : vector<8x256xf32>
    %8 = arith.mulf %7, %7 : vector<8x256xf32>
    %cst = arith.constant -5.000000e-01 : f32
    %9 = vector.broadcast %cst : f32 to vector<8x256xf32>
    %10 = arith.mulf %9, %8 : vector<8x256xf32>
    %11 = math.log %2 : vector<8x256xf32>
    %12 = arith.subf %10, %11 : vector<8x256xf32>
    %cst_7 = arith.constant 0.918938517 : f32
    %13 = vector.broadcast %cst_7 : f32 to vector<8x256xf32>
    %14 = arith.subf %12, %13 : vector<8x256xf32>
    %15 = arith.addf %0, %14 : vector<8x256xf32>
    %cst_8 = arith.constant dense<0xFF800000> : vector<256xf32>
    %16 = vector.multi_reduction <maximumf>, %15, %cst_8 [0] : vector<8x256xf32> to vector<256xf32>
    %17 = vector.shape_cast %16 : vector<256xf32> to vector<1x256xf32>
    %18 = vector.broadcast %17 : vector<1x256xf32> to vector<8x256xf32>
    %19 = arith.subf %15, %18 : vector<8x256xf32>
    %20 = math.exp %19 : vector<8x256xf32>
    %cst_9 = arith.constant dense<0.000000e+00> : vector<256xf32>
    %21 = vector.multi_reduction <add>, %20, %cst_9 [0] : vector<8x256xf32> to vector<256xf32>
    %22 = vector.shape_cast %21 : vector<256xf32> to vector<1x256xf32>
    %23 = math.log %22 : vector<1x256xf32>
    %24 = arith.addf %17, %23 : vector<1x256xf32>
    %cst_10 = arith.constant dense<0xFF800000> : vector<256xf32>
    %25 = vector.multi_reduction <maximumf>, %0, %cst_10 [0] : vector<8x256xf32> to vector<256xf32>
    %26 = vector.shape_cast %25 : vector<256xf32> to vector<1x256xf32>
    %27 = vector.broadcast %26 : vector<1x256xf32> to vector<8x256xf32>
    %28 = arith.subf %0, %27 : vector<8x256xf32>
    %29 = math.exp %28 : vector<8x256xf32>
    %cst_11 = arith.constant dense<0.000000e+00> : vector<256xf32>
    %30 = vector.multi_reduction <add>, %29, %cst_11 [0] : vector<8x256xf32> to vector<256xf32>
    %31 = vector.shape_cast %30 : vector<256xf32> to vector<1x256xf32>
    %32 = math.log %31 : vector<1x256xf32>
    %33 = arith.addf %26, %32 : vector<1x256xf32>
    %34 = arith.subf %24, %33 : vector<1x256xf32>
    %c256_i32 = arith.constant 256 : i32
    %35 = arith.muli %arg0, %c256_i32 : i32
    %36 = tpu.iota {dimensions = array<i32: 1>} : vector<1x256xi32>
    %37 = vector.broadcast %35 : i32 to vector<1x256xi32>
    %38 = arith.addi %37, %36 : vector<1x256xi32>
    %c300_i32 = arith.constant 300 : i32
    %39 = vector.broadcast %c300_i32 : i32 to vector<1x256xi32>
    %40 = arith.cmpi slt, %38, %39 : vector<1x256xi32>
    %cst_12 = arith.constant 0.000000e+00 : f32
    %41 = vector.broadcast %cst_12 : f32 to vector<1x256xf32>
    %42 = arith.select %40, %34, %41 : vector<1x256xi1>, vector<1x256xf32>
    %43 = vector.shape_cast %42 : vector<1x256xf32> to vector<1x1x256xf32>
    %cst_13 = arith.constant dense<0.000000e+00> : vector<1xf32>
    %44 = vector.multi_reduction <add>, %43, %cst_13 [1, 2] : vector<1x1x256xf32> to vector<1xf32>
    %45 = vector.shape_cast %44 : vector<1xf32> to vector<1x1x1xf32>
    %46 = vector.extract %45[0, 0, 0] : f32 from vector<1x1x1xf32>
    %47 = vector.broadcast %46 : f32 to vector<1x1x128xf32>
    %c0_14 = arith.constant 0 : index
    %c0_15 = arith.constant 0 : index
    %c0_16 = arith.constant 0 : index
    %48 = vector.load %arg5[%c0_14, %c0_15, %c0_16] : memref<1x1x128xf32, #tpu.memory_space<vmem>>, vector<1x1x128xf32>
    tpu.vector_store %arg5[%c0_14, %c0_15, %c0_16], %47 {strides = array<i32>} : memref<1x1x128xf32, #tpu.memory_space<vmem>>, vector<1x1x128xf32>,
    return
  }
  func.func @transform_0(%arg0: i32) -> (i32, i32) {
    %c0_i32 = arith.constant 0 : i32
    %c0_i32_0 = arith.constant 0 : i32
    return %c0_i32, %arg0 : i32, i32
  }
  func.func @transform_1(%arg0: i32) -> (i32, i32) {
    %c0_i32 = arith.constant 0 : i32
    %c0_i32_0 = arith.constant 0 : i32
    return %c0_i32, %arg0 : i32, i32
  }
  func.func @transform_2(%arg0: i32) -> (i32, i32) {
    %c0_i32 = arith.constant 0 : i32
    %c0_i32_0 = arith.constant 0 : i32
    return %c0_i32, %arg0 : i32, i32
  }
  func.func @transform_3(%arg0: i32) -> (i32, i32) {
    %c0_i32 = arith.constant 0 : i32
    %c0_i32_0 = arith.constant 0 : i32
    return %c0_i32, %arg0 : i32, i32
  }
  func.func @transform_4(%arg0: i32) -> (i32, i32, i32) {
    %c0_i32 = arith.constant 0 : i32
    %c0_i32_0 = arith.constant 0 : i32
    %c0_i32_1 = arith.constant 0 : i32
    return %arg0, %c0_i32, %c0_i32_0 : i32, i32, i32
  }
}

</mosaic_0001>

<bundles_post_ra>
// kernel: tpu_custom_call.1
= control target key start
LH: loop header
LB: loop body
LE: loop exit
PB: predicated region body
PF: predicated region fallthrough
CT: control target
= control target key end

     0   :  { %9 = vsyncpa [#allocation3], 0  ;;  %s1178_s0 = inlined_call_operand.hbm [shape: f32[8,300], index: 0, kind: input, shape index: {}]   ;;  %s1179_s1 = inlined_call_operand.hbm [shape: f32[8,300], index: 1, kind: input, shape index: {}]   ;;  %s1180_s2 = inlined_call_operand.hbm [shape: f32[8,300], index: 2, kind: input, shape index: {}]   ;;  %s1181_s3 = inlined_call_operand.vmem [shape: f32[1,300], index: 3, kind: input, shape index: {}]   ;;  %s1182_s4 = inlined_call_operand.hbm [shape: f32[2,1,128], index: 4, kind: output, shape index: {}]  }
   0x1   :  { %11 = vsyncpa [#allocation3 + $0x1], 0 }
   0x2   :  { %12 = vsyncpa [#allocation6], 0 }
   0x3   :  { %14 = vsyncpa [#allocation6 + $0x1], 0 }
   0x4   :  { %15 = vsyncpa [#allocation4], 0 }
   0x5   :  { %17 = vsyncpa [#allocation4 + $0x1], 0  ;;  %s918_s15 = smov 0   ;;  %s920_s16 = smov 0  }
   0x6   :  { %s922_s17 = smov 0   ;;  %s924_s18 = smov 0  }
   0x7 LB: > { %s939_s19 = sadd.s32 4294967295, %s887_s18   ;;  %s627_s20 = sadd.s32 4294967294, %s887_s18   ;;  %s887_s18 = sphi %s924_s18, %s1200_s18   ;;  %s883_s17 = sphi %s922_s17, %s1199_s17   ;;  %s879_s16 = sphi %s920_s16, %s1198_s16   ;;  %s875_s15 = sphi %s918_s15, %s1197_s15  }
   0x8   : > { %s943_s21 = sadd.s32 1, %s887_s18   ;;  %s30_s22 = sadd.s32 1, %s883_s17 }
   0x9   : > { %s27_s23 = ssub.s32 %s887_s18, %s943_s21  ;;  %p37_p0 = scmp.ne.s32.totalorder %s883_s17, %s879_s16 }
   0xa   : > { %p28_p1 = scmp.eq.s32.totalorder %s27_s23, 0  ;;  %p38_p2 = scmp.eq.s32.totalorder %s887_s18, 0 }
   0xb   : > { %p43_p3 = scmp.ne.s32.totalorder %s879_s16, %s875_s15  ;;  %p44_p4 = scmp.eq.s32.totalorder %s939_s19, 0 }
   0xc   : > { %s955_s24 = scalar_select %p28_p1, %s883_s17, %s30_s22  }
   0xd   : > { %p957_p5 = por %p38_p2, %p37_p0  ;;  %p961_p6 = por %p44_p4, %p43_p3 }
   0xe   : > { %p145_p7 = scmp.eq.s32.totalorder %s939_s19, 1  ;;  %p151_p8 = scmp.eq.s32.totalorder %s627_s20, 1 }
   0xf   : > { %s1187_s25 = scalar_select %p957_p5, 1, 0 }
  0x10   : > { %s1188_s26 = scalar_select %p961_p6, 1, 0 }
  0x11   : > { %p966_p9 = por %p145_p7, %p37_p0  ;;  %p970_p10 = por %p151_p8, %p43_p3 }
  0x12   : > { %p1183_p11 = scmp.ge.s32.totalorder %s887_s18, 2 }
  0x13   : > { %s1189_s27 = scalar_select %p966_p9, 1, 0 }
  0x14   : > { %s1190_s28 = scalar_select %p970_p10, 1, 0 }
  0x15   : > { %167 = sbr.rel (%p1183_p11) target bundleno = 134 (0x86), region = 16 }
  0x1c   : > { %170 = sbr.rel (!%p957_p5) target bundleno = 62 (0x3e), region = 20  ;;  %s171_s29 = sand.u32 (%p957_p5), 1, %s883_s17  }
  0x1d   : > { %s631_s30 = sshll.u32 (%p957_p5), %s887_s18, 1  ;;  %s630_s5 = sshll.u32 (%p957_p5), %s171_s29, 4 }
  0x1e   : > { %s177_s6 = ssub.s32 (%p957_p5), 3, %s631_s30  ;;  %s984_s9 = scalar_lea.sflag (%p957_p5), [#allocation3], %s171_s29 }
  0x1f   : > { %p178_p12 = scmp.lt.s32.totalorder (%p957_p5), %s177_s6, 2  ;;  %s175_s10 = scalar_lea.vmem (%p957_p5), [#allocation2], %s630_s5 }
  0x23   : > { %s1202_s6 = smov (!%p178_p12, %s177_s6), 2 }
  0x24   : > { %s981_s7 = sshll.u32 %s1202_s6, 7 }
  0x25   : > { %s182_s8 = ssub.s32 256, %s981_s7 }
  0x26   : > { %183 = vsyncadd %s984_s9, %s182_s8  ;;  %p633_p13 = scmp.ne.s32.totalorder %s981_s7, 0  ;;  %s662_s11 = sshll.u32 %s887_s18, 8 }
  0x27   : > { %s992_s14 = scalar_lea.hbm %s1178_s0, %s662_s11  ;;  %s189_s20 = sshll.u32 %s175_s10, 4  ;;  %s190_s20 = int_to_ptr.vmem [resolvable:$true] %s189_s20 }
  0x28   : > { %s733_s22 = scalar_lea.hbm %s992_s14, %s981_s7  ;;  %s737_s30 = scalar_lea.hbm %s1178_s0, 384 }
  0x29   : > { %p734_p0 = scmp.ne.s32.totalorder %s992_s14, %s733_s22  ;;  %p738_p3 = scmp.lt.u32.totalorder %s992_s14, %s1178_s0 }
  0x2a   : > { %p739_p4 = scmp.lt.u32.totalorder %s737_s30, %s733_s22  ;;  %p741_p8 = scmp.lt.u32.totalorder %s733_s22, %s992_s14 }
  0x2b   : > { %p735_p1 = pnand %p734_p0, %p633_p13 }
  0x2c   : > { %p740_p7 = por %p739_p4, %p738_p3 }
  0x2d   : > { %p736_p2 = pneg %p735_p1 }
  0x2e   : > { %p742_p12 = por %p741_p8, %p740_p7 }
  0x30   : > { %p743_p11 = pnand %p742_p12, %p736_p2 }
  0x32   : > { %746 = shalt.err (!%p743_p11)
}
  0x33   : > { %s747_s8 = scalar_lea.vmem %s190_s20, %s981_s7  ;;  %s889_s10 = smov [#allocation2]  }
  0x34   : > { %p748_p10 = scmp.ne.s32.totalorder %s190_s20, %s747_s8  ;;  %s751_s11 = sshll.u32 %s889_s10, 4  ;;  %s752_s11 = int_to_ptr.vmem [resolvable:$false] %s751_s11 }
  0x35   : > { %s753_s12 = scalar_lea.vmem %s752_s11, 512  ;;  %p754_p9 = scmp.lt.s32.totalorder %s190_s20, %s752_s11 }
  0x36   : > { %p749_p0 = pnand %p748_p10, %p633_p13  ;;  %p755_p6 = scmp.lt.s32.totalorder %s753_s12, %s747_s8 }
  0x38   : > { %p750_p1 = pneg %p749_p0  ;;  %p756_p5 = por %p755_p6, %p754_p9 }
  0x3a   : > { %p757_p3 = pnand %p756_p5, %p750_p1 }
  0x3c   : > { %760 = shalt.err (!%p757_p3)
}
  0x3d   : > { %192 = dma.hbm_to_vmem [thread:$0]  (%p633_p13), %s992_s14, %s981_s7, %s190_s20, %s984_s9  }
  0x3e PF: > { %p1191_p11 = scmp.ne.s32.totalorder %s1187_s25, 0 }
  0x3f   : > { %s196_s13 = sand.u32 (%p1191_p11), 1, %s887_s18   ;;  %s198_s22 = sand.u32 (%p1191_p11), 1, %s883_s17  }
  0x40   : > { %195 = sbr.rel (!%p1191_p11) target bundleno = 98 (0x62), region = 24  ;;  %s637_s23 = sshll.u32 (%p1191_p11), %s198_s22, 4 }
  0x41   : > { %s638_s29 = sshll.u32 (%p1191_p11), %s887_s18, 1  ;;  %s1023_s8 = scalar_lea.sflag (%p1191_p11), [#allocation6], %s196_s13 }
  0x42   : > { %s202_s30 = ssub.s32 (%p1191_p11), 3, %s638_s29  ;;  %s200_s7 = scalar_lea.vmem (%p1191_p11), [#allocation5], %s637_s23 }
  0x43   : > { %p203_p5 = scmp.lt.s32.totalorder (%p1191_p11), %s202_s30, 2 }
  0x47   : > { %s1204_s30 = smov (!%p203_p5, %s202_s30), 2 }
  0x48   : > { %s1020_s5 = sshll.u32 %s1204_s30, 7 }
  0x49   : > { %s207_s6 = ssub.s32 256, %s1020_s5 }
  0x4a   : > { %208 = vsyncadd %s1023_s8, %s207_s6  ;;  %p640_p6 = scmp.ne.s32.totalorder %s1020_s5, 0  ;;  %s663_s9 = sshll.u32 %s887_s18, 8 }
  0x4b   : > { %s1031_s10 = scalar_lea.hbm %s1179_s1, %s663_s9  ;;  %s214_s11 = sshll.u32 %s200_s7, 4  ;;  %s215_s11 = int_to_ptr.vmem [resolvable:$true] %s214_s11 }
  0x4c   : > { %s761_s12 = scalar_lea.hbm %s1031_s10, %s1020_s5  ;;  %s765_s23 = scalar_lea.hbm %s1179_s1, 384 }
  0x4d   : > { %p762_p9 = scmp.ne.s32.totalorder %s1031_s10, %s761_s12  ;;  %p766_p2 = scmp.lt.u32.totalorder %s1031_s10, %s1179_s1 }
  0x4e   : > { %p767_p4 = scmp.lt.u32.totalorder %s765_s23, %s761_s12  ;;  %p769_p8 = scmp.lt.u32.totalorder %s761_s12, %s1031_s10 }
  0x4f   : > { %p763_p10 = pnand %p762_p9, %p640_p6 }
  0x50   : > { %p768_p7 = por %p767_p4, %p766_p2 }
  0x51   : > { %p764_p13 = pneg %p763_p10 }
  0x52   : > { %p770_p12 = por %p769_p8, %p768_p7 }
  0x54   : > { %p771_p0 = pnand %p770_p12, %p764_p13 }
  0x56   : > { %774 = shalt.err (!%p771_p0)
}
  0x57   : > { %s775_s6 = scalar_lea.vmem %s215_s11, %s1020_s5  ;;  %s890_s7 = smov [#allocation5]  }
  0x58   : > { %p776_p1 = scmp.ne.s32.totalorder %s215_s11, %s775_s6  ;;  %s779_s9 = sshll.u32 %s890_s7, 4  ;;  %s780_s9 = int_to_ptr.vmem [resolvable:$false] %s779_s9 }
  0x59   : > { %s781_s14 = scalar_lea.vmem %s780_s9, 512  ;;  %p782_p5 = scmp.lt.s32.totalorder %s215_s11, %s780_s9 }
  0x5a   : > { %p777_p3 = pnand %p776_p1, %p640_p6  ;;  %p783_p9 = scmp.lt.s32.totalorder %s781_s14, %s775_s6 }
  0x5c   : > { %p778_p11 = pneg %p777_p3  ;;  %p784_p10 = por %p783_p9, %p782_p5 }
  0x5e   : > { %p785_p2 = pnand %p784_p10, %p778_p11 }
  0x60   : > { %788 = shalt.err (!%p785_p2)
}
  0x61   : > { %217 = dma.hbm_to_vmem [thread:$0]  (%p640_p6), %s1031_s10, %s1020_s5, %s215_s11, %s1023_s8  }
  0x62 PF: > { %p1192_p13 = scmp.ne.s32.totalorder %s1187_s25, 0 }
  0x63   : > { %s221_s20 = sand.u32 (%p1192_p13), 1, %s887_s18   ;;  %s223_s12 = sand.u32 (%p1192_p13), 1, %s883_s17  }
  0x64   : > { %220 = sbr.rel (!%p1192_p13) target bundleno = 134 (0x86), region = 28  ;;  %s644_s13 = sshll.u32 (%p1192_p13), %s223_s12, 4 }
  0x65   : > { %s645_s22 = sshll.u32 (%p1192_p13), %s887_s18, 1  ;;  %s1062_s6 = scalar_lea.sflag (%p1192_p13), [#allocation6], %s221_s20 }
  0x66   : > { %s227_s23 = ssub.s32 (%p1192_p13), 3, %s645_s22  ;;  %s225_s5 = scalar_lea.vmem (%p1192_p13), [#allocation7], %s644_s13 }
  0x67   : > { %p228_p4 = scmp.lt.s32.totalorder (%p1192_p13), %s227_s23, 2 }
  0x6b   : > { %s1206_s23 = smov (!%p228_p4, %s227_s23), 2 }
  0x6c   : > { %s1059_s29 = sshll.u32 %s1206_s23, 7 }
  0x6d   : > { %s232_s30 = ssub.s32 256, %s1059_s29 }
  0x6e   : > { %233 = vsyncadd %s1062_s6, %s232_s30  ;;  %p647_p6 = scmp.ne.s32.totalorder %s1059_s29, 0  ;;  %s664_s25 = sshll.u32 %s887_s18, 8 }
  0x6f   : > { %s1070_s11 = scalar_lea.hbm %s1180_s2, %s664_s25  ;;  %s239_s7 = sshll.u32 %s225_s5, 4  ;;  %s240_s7 = int_to_ptr.vmem [resolvable:$true] %s239_s7 }
  0x70   : > { %s789_s9 = scalar_lea.hbm %s1070_s11, %s1059_s29  ;;  %s793_s12 = scalar_lea.hbm %s1180_s2, 384 }
  0x71   : > { %p790_p7 = scmp.ne.s32.totalorder %s1070_s11, %s789_s9  ;;  %p794_p0 = scmp.lt.u32.totalorder %s1070_s11, %s1180_s2 }
  0x72   : > { %p795_p1 = scmp.lt.u32.totalorder %s793_s12, %s789_s9  ;;  %p797_p11 = scmp.lt.u32.totalorder %s789_s9, %s1070_s11 }
  0x73   : > { %p791_p8 = pnand %p790_p7, %p647_p6 }
  0x74   : > { %p796_p3 = por %p795_p1, %p794_p0 }
  0x75   : > { %p792_p12 = pneg %p791_p8 }
  0x76   : > { %p798_p5 = por %p797_p11, %p796_p3 }
  0x78   : > { %p799_p9 = pnand %p798_p5, %p792_p12 }
  0x7a   : > { %802 = shalt.err (!%p799_p9)
}
  0x7b   : > { %s803_s23 = scalar_lea.vmem %s240_s7, %s1059_s29  ;;  %s891_s30 = smov [#allocation7]  }
  0x7c   : > { %p804_p10 = scmp.ne.s32.totalorder %s240_s7, %s803_s23  ;;  %s807_s5 = sshll.u32 %s891_s30, 4  ;;  %s808_s5 = int_to_ptr.vmem [resolvable:$false] %s807_s5 }
  0x7d   : > { %s809_s25 = scalar_lea.vmem %s808_s5, 512  ;;  %p810_p4 = scmp.lt.s32.totalorder %s240_s7, %s808_s5 }
  0x7e   : > { %p805_p2 = pnand %p804_p10, %p647_p6  ;;  %p811_p7 = scmp.lt.s32.totalorder %s809_s25, %s803_s23 }
  0x80   : > { %p806_p13 = pneg %p805_p2  ;;  %p812_p8 = por %p811_p7, %p810_p4 }
  0x82   : > { %p813_p0 = pnand %p812_p8, %p806_p13 }
  0x84   : > { %816 = shalt.err (!%p813_p0)
}
  0x85   : > { %242 = dma.hbm_to_vmem [thread:$0]  (%p647_p6), %s1070_s11, %s1059_s29, %s240_s7, %s1062_s6  }
  0x86 PF: > { %p651_p12 = scmp.ge.s32.totalorder %s887_s18, 1  ;;  %p260_p1 = scmp.lt.s32.totalorder %s887_s18, 3 }
  0x88   : > { %p261_p3 = pnand %p651_p12, %p260_p1 }
  0x89   : > { %s1096_s8 = sand.u32 (!%p261_p3), 1, %s879_s16   ;;  %p1193_p6 = scmp.ne.s32.totalorder (!%p261_p3), %s1188_s26, 0 }
  0x8a   : > { %264 = sbr.rel (%p261_p3) target bundleno = 454 (0x1c6), region = 36  ;;  %s1099_s10 = sshll.u32 (!%p261_p3), %s1096_s8, 4 }
  0x8b   : > { %s267_s9 = scalar_lea.sflag (!%p261_p3), [#allocation3], %s1096_s8  ;;  %s270_s14 = scalar_lea.vmem (!%p261_p3), [#allocation2], %s1099_s10 }
  0x91   : > { %862 = dma.done.wait (%p1193_p6), %s267_s9, 256  }
  0x92   : > { %864 = vsyncadd (%p1193_p6), %s267_s9, 4294967040  ;;  %s275_s29 = sand.u32 1, %s939_s19   ;;  %s279_s11 = scalar_lea.vmem [#allocation5], %s1099_s10 }
  0x93   : > { %s276_s6 = scalar_lea.sflag [#allocation6], %s275_s29 }
  0x94   : > { %866 = dma.done.wait (%p1193_p6), %s276_s6, 512  }
  0x95   : > { %868 = vsyncadd (%p1193_p6), %s276_s6, 4294966784  ;;  %s655_s7 = sshll.u32 %s939_s19, 1  ;;  %v368_v0 = vlaneseq  ;;  %v358_v2 = vld [vmem:[%s270_s14] sm:$0xff]  ;;  %v359_v3 = vld [vmem:[%s270_s14 + $0x8] sm:$0xff]  ;;  %s288_s22 = scalar_lea.vmem [#allocation7], %s1099_s10  ;;  %vm481_vm2 = vcmask 1040384  }
  0x96   : > { %p350_p11 = scmp.lt.s32.totalorder %s655_s7, 2  ;;  %v362_v4 = vld [vmem:[%s288_s22] sm:$0xff]  ;;  %v363_v5 = vld [vmem:[%s288_s22 + $0x8] sm:$0xff]  ;;  %v432_v7 = vrot.slane %v358_v2, 4  ;;  %v438_v8 = vrot.slane %v359_v3, 4  ;;  %s658_s26 = sshll.u32 %s939_s19, 8 }
  0x97   : > { %v369_v1 = vshrl.u32 %v368_v0, 7  ;;  %709 = vrcp.f32 %v362_v4  ;;  %v360_v15 = vld [vmem:[%s279_s11] sm:$0xff]  ;;  %v361_v18 = vld [vmem:[%s279_s11 + $0x8] sm:$0xff]  ;;  %s329_s23 = scalar_lea.vmem [#allocation8], %s1096_s8  ;;  %s659_s5 = sshll.u32 %s939_s19, 4 }
  0x98   : > { %s1208_s7 = smov (!%p350_p11, %s655_s7), 2  ;;  %711 = vrcp.f32 %v363_v5  ;;  %v433_v11 = vmax.f32 %v358_v2, %v432_v7  ;;  %v439_v12 = vmax.f32 %v359_v3, %v438_v8  ;;  %s509_s30 = sshll.u32 %s329_s23, 4  ;;  %s1131_s30 = int_to_ptr.vmem [resolvable:$true] %s509_s30 }
  0x99   : > { %s352_s13 = scalar_lea.vmem %s1181_s3, %s1208_s7  ;;  %v370_v6 = vsub.s32 0, %v369_v1  ;;  %v374_v10 = vsub.s32 1, %v369_v1  ;;  %713 = vlog2.f32 %v362_v4  ;;  %s1136_s14 = scalar_lea.hbm %s1182_s4, %s659_s5 }
  0x9a   : > { %v364_v9 = vld [vmem:[%s352_s13] sm:$0x3]  ;;  %715 = vlog2.f32 %v363_v5  ;;  %v434_v14 = vrot.slane %v433_v11, 2  ;;  %v440_v17 = vrot.slane %v439_v12, 2  ;;  %s497_s29 = scalar_lea.sflag [#allocation4], %s1096_s8  ;;  %s817_s6 = scalar_lea.vmem %s1131_s30, 16 }
  0x9b   : > { %v371_v13 = vrot.slane %v364_v9, %v370_v6  ;;  %v375_v16 = vrot.slane %v364_v9, %v374_v10  ;;  %p818_p5 = scmp.ne.s32.totalorder %s1131_s30, %s817_s6  ;;  %p1194_p9 = scmp.ne.s32.totalorder %s1189_s27, 0 }
  0x9c   : > { %v435_v19 = vmax.f32 %v433_v11, %v434_v14  ;;  %v441_v20 = vmax.f32 %v439_v12, %v440_v17  ;;  %s892_s19 = smov [#allocation8]  }
  0x9d   : > { %v378_v21 = vsub.f32 %v371_v13, %v360_v15  ;;  %v379_v23 = vsub.f32 %v375_v16, %v361_v18  ;;  %p819_p10 = pnand %p818_p5, %p1194_p9  ;;  %s821_s11 = sshll.u32 %s892_s19, 4  ;;  %s822_s11 = int_to_ptr.vmem [resolvable:$false] %s821_s11 }
  0x9e   : > { %v436_v22 = vrot.slane %v435_v19, 1  ;;  %v442_v24 = vrot.slane %v441_v20, 1  ;;  %s823_s7 = scalar_lea.vmem %s822_s11, 32  ;;  %p824_p13 = scmp.lt.s32.totalorder %s1131_s30, %s822_s11 }
  0x9f   : > { %p820_p2 = pneg %p819_p10  ;;  %p825_p4 = scmp.lt.s32.totalorder %s823_s7, %s817_s6 }
  0xa0   : > { %v1119_v25 = vmax.f32 %v435_v19, %v436_v22  ;;  %v1121_v27 = vmax.f32 %v441_v20, %v442_v24 }
  0xa1   : > { %v710_v26 = vpop.eup %709  ;;  %p826_p7 = por %p825_p4, %p824_p13 }
  0xa2   : > { %v712_v28 = vpop.eup %711  ;;  %v380_v29 = vmul.f32 %v710_v26, %v378_v21  ;;  %v444_v30 = vsub.f32 %v358_v2, %v1119_v25  ;;  %v445_v33 = vsub.f32 %v359_v3, %v1121_v27 }
  0xa3   : > { %v714_v31 = vpop.eup %713  ;;  %v381_v32 = vmul.f32 %v712_v28, %v379_v23  ;;  %p827_p8 = pnand %p826_p7, %p820_p2 }
  0xa4   : > { %v716_v34 = vpop.eup %715  ;;  %v382_v35 = vmul.f32 %v380_v29, %v380_v29  ;;  %v387_v36 = vmul.f32 0.6931472, %v714_v31  ;;  %v446_v40 = vmul.f32 1.442695, %v444_v30  ;;  %v448_v42 = vmul.f32 1.442695, %v445_v33 }
  0xa5   : > { %v383_v37 = vmul.f32 %v381_v32, %v381_v32  ;;  %v389_v38 = vmul.f32 0.6931472, %v716_v34  ;;  %v472_v32 = vand.u32 127, %v368_v0 }
  0xa6   : > { %v384_v39 = vmul.f32 -0.5, %v382_v35  ;;  %717 = vpow2.f32 %v446_v40 }
  0xa7   : > { %v385_v41 = vmul.f32 -0.5, %v383_v37  ;;  %719 = vpow2.f32 %v448_v42  ;;  %v474_v37 = vstv %s658_s26 }
  0xa8   : > { %v390_v43 = vsub.f32 %v384_v39, %v387_v36  ;;  %v473_v36 = vadd.s32 128, %v472_v32  ;;  %v475_v40 = vadd.s32 %v474_v37, %v472_v32 }
  0xa9   : > { %v391_v44 = vsub.f32 %v385_v41, %v389_v38 }
  0xaa   : > { %v656_v45 = vadd.f32 -0.9189385, %v390_v43  ;;  %vm477_vm0 = vcmp.lt.s32.totalorder %v475_v40, 300 }
  0xab   : > { %v657_v46 = vadd.f32 -0.9189385, %v391_v44  ;;  %v476_v44 = vadd.s32 %v474_v37, %v473_v36 }
  0xac   : > { %v394_v47 = vadd.f32 %v656_v45, %v358_v2 }
  0xad   : > { %v395_v48 = vadd.f32 %v657_v46, %v359_v3  ;;  %vm478_vm1 = vcmp.lt.s32.totalorder %v476_v44, 300 }
  0xae   : > { %v396_v49 = vrot.slane %v394_v47, 4 }
  0xaf   : > { %v402_v50 = vrot.slane %v395_v48, 4 }
  0xb0   : > { %v397_v51 = vmax.f32 %v394_v47, %v396_v49  ;;  %v718_v55 = vpop.eup %717 }
  0xb1   : > { %v403_v52 = vmax.f32 %v395_v48, %v402_v50  ;;  %v720_v57 = vpop.eup %719  ;;  %v450_v61 = vrot.slane %v718_v55, 4 }
  0xb2   : > { %v398_v53 = vrot.slane %v397_v51, 2  ;;  %v456_v63 = vrot.slane %v720_v57, 4 }
  0xb3   : > { %v404_v54 = vrot.slane %v403_v52, 2  ;;  %v451_v2 = vadd.f32 %v718_v55, %v450_v61 }
  0xb4   : > { %v399_v56 = vmax.f32 %v397_v51, %v398_v53  ;;  %v457_v6 = vadd.f32 %v720_v57, %v456_v63 }
  0xb5   : > { %v405_v58 = vmax.f32 %v403_v52, %v404_v54  ;;  %v452_v8 = vrot.slane %v451_v2, 2 }
  0xb6   : > { %v400_v59 = vrot.slane %v399_v56, 1  ;;  %v458_v9 = vrot.slane %v457_v6, 2 }
  0xb7   : > { %v406_v60 = vrot.slane %v405_v58, 1  ;;  %v453_v10 = vadd.f32 %v452_v8, %v451_v2 }
  0xb8   : > { %v401_v62 = vmax.f32 %v399_v56, %v400_v59  ;;  %v459_v11 = vadd.f32 %v458_v9, %v457_v6 }
  0xb9   : > { %v407_v1 = vmax.f32 %v405_v58, %v406_v60  ;;  %v454_v12 = vrot.slane %v453_v10, 1 }
  0xba   : > { %v408_v4 = vsub.f32 %v394_v47, %v401_v62  ;;  %v460_v14 = vrot.slane %v459_v11, 1 }
  0xbb   : > { %v409_v5 = vsub.f32 %v395_v48, %v407_v1  ;;  %v455_v19 = vadd.f32 %v454_v12, %v453_v10 }
  0xbc   : > { %v410_v3 = vmul.f32 1.442695, %v408_v4  ;;  %v461_v21 = vadd.f32 %v460_v14, %v459_v11 }
  0xbd   : > { %v412_v7 = vmul.f32 1.442695, %v409_v5 }
  0xbe   : > { %721 = vpow2.f32 %v410_v3 }
  0xbf   : > { %723 = vpow2.f32 %v412_v7 }
  0xc0   : > { %725 = vlog2.f32 %v455_v19 }
  0xc1   : > { %727 = vlog2.f32 %v461_v21 }
  0xc8   : > { %v722_v13 = vpop.eup %721 }
  0xc9   : > { %v724_v15 = vpop.eup %723  ;;  %v414_v16 = vrot.slane %v722_v13, 4 }
  0xca   : > { %v420_v17 = vrot.slane %v724_v15, 4  ;;  %v726_v33 = vpop.eup %725 }
  0xcb   : > { %v415_v18 = vadd.f32 %v722_v13, %v414_v16  ;;  %v728_v34 = vpop.eup %727  ;;  %v463_v35 = vmul.f32 0.6931472, %v726_v33 }
  0xcc   : > { %v421_v20 = vadd.f32 %v724_v15, %v420_v17  ;;  %v465_v38 = vmul.f32 0.6931472, %v728_v34 }
  0xcd   : > { %v416_v22 = vrot.slane %v415_v18, 2  ;;  %v466_v43 = vadd.f32 %v463_v35, %v1119_v25 }
  0xce   : > { %v422_v23 = vrot.slane %v421_v20, 2  ;;  %v467_v46 = vadd.f32 %v465_v38, %v1121_v27 }
  0xcf   : > { %v417_v24 = vadd.f32 %v416_v22, %v415_v18 }
  0xd0   : > { %v423_v26 = vadd.f32 %v422_v23, %v421_v20 }
  0xd1   : > { %v418_v28 = vrot.slane %v417_v24, 1 }
  0xd2   : > { %v424_v29 = vrot.slane %v423_v26, 1 }
  0xd3   : > { %v419_v30 = vadd.f32 %v418_v28, %v417_v24 }
  0xd4   : > { %v425_v31 = vadd.f32 %v424_v29, %v423_v26 }
  0xd5   : > { %729 = vlog2.f32 %v419_v30 }
  0xd6   : > { %731 = vlog2.f32 %v425_v31 }
  0xdf   : > { %v730_v39 = vpop.eup %729 }
  0xe0   : > { %v732_v41 = vpop.eup %731  ;;  %v427_v42 = vmul.f32 0.6931472, %v730_v39 }
  0xe1   : > { %v429_v45 = vmul.f32 0.6931472, %v732_v41 }
  0xe2   : > { %v430_v47 = vadd.f32 %v427_v42, %v401_v62 }
  0xe3   : > { %v431_v48 = vadd.f32 %v429_v45, %v407_v1 }
  0xe4   : > { %v468_v0 = vsub.f32 %v430_v47, %v466_v43 }
  0xe5   : > { %v469_v49 = vsub.f32 %v431_v48, %v467_v46 }
  0xe6   : > { %v479_v50 = vsel %vm477_vm0, %v468_v0, 0.0 }
  0xe7   : > { %v480_v51 = vsel %vm478_vm1, %v469_v49, 0.0  ;;  %v482_v52 = vsel %vm481_vm2, %v479_v50, 0.0 }
  0xe8   : > { %v483_v53 = vsel %vm481_vm2, %v480_v51, 0.0 }
  0xe9   : > { %v484_v54 = vadd.f32 %v483_v53, %v482_v52 }
  0xeb   : > { %485 = vadd.xlane.f32.xlu0 %v484_v54 }
 0x178   : > { %v486_v25 = vpop.xlane.xlu0 %485 }
 0x179   : > { %v487_v55 = vrot.slane %v486_v25, 4 }
 0x17b   : > { %v488_v56 = vadd.f32 %v487_v55, %v486_v25 }
 0x17d   : > { %v489_v27 = vrot.slane %v488_v56, 2 }
 0x17f   : > { %v490_v57 = vadd.f32 %v489_v27, %v488_v56 }
 0x181   : > { %v491_v58 = vrot.slane %v490_v57, 1 }
 0x183   : > { %v492_v59 = vadd.f32 %v491_v58, %v490_v57 }
 0x185   : > { %665 = vpush %v492_v59 }
 0x1b6   : > { %s666_s25 = spop %665 }
 0x1b7   : > { %v494_v60 = vstv %s666_s25 }
 0x1b8   : > { %495 = vst [vmem:[%s329_s23] sm:$0x1] %v494_v60 }
 0x1b9   : > { %830 = shalt.err (!%p827_p8)
}
 0x1ba   : > { %s831_s8 = scalar_lea.hbm %s1136_s14, 16  ;;  %s835_s13 = scalar_lea.hbm %s1182_s4, 32 }
 0x1bb   : > { %p832_p0 = scmp.ne.s32.totalorder %s1136_s14, %s831_s8  ;;  %p836_p3 = scmp.lt.u32.totalorder %s1136_s14, %s1182_s4 }
 0x1bc   : > { %p837_p6 = scmp.lt.u32.totalorder %s835_s13, %s831_s8  ;;  %p839_p5 = scmp.lt.u32.totalorder %s831_s8, %s1136_s14 }
 0x1bd   : > { %p833_p12 = pnand %p832_p0, %p1194_p9 }
 0x1be   : > { %p838_p11 = por %p837_p6, %p836_p3 }
 0x1bf   : > { %p834_p1 = pneg %p833_p12 }
 0x1c0   : > { %p840_p10 = por %p839_p5, %p838_p11 }
 0x1c2   : > { %p841_p2 = pnand %p840_p10, %p834_p1 }
 0x1c4   : > { %844 = shalt.err (!%p841_p2)
}
 0x1c5   : > { %670 = dma.vmem_to_hbm [thread:$0]  (%p1194_p9), %s1131_s30, 16, %s1136_s14, %s497_s29  }
 0x1c6 PF: > { %s521_s23 = sand.u32 1, %s875_s15   ;;  %p1195_p13 = scmp.ne.s32.totalorder %s1190_s28, 0 }
 0x1c7   : > { %p1196_p4 = scmp.ge.s32.totalorder %s887_s18, 2  ;;  %s522_s5 = scalar_lea.sflag [#allocation4], %s521_s23 }
 0x1c9   : > { %p673_p7 = pnand %p1196_p4, %p1195_p13 }
 0x1cb   : > { %870 = dma.done.wait (!%p673_p7), %s522_s5, 16  }
 0x1cc   : > { %872 = vsyncadd (!%p673_p7), %s522_s5, 4294967280  ;;  %p20_p8 = scmp.ge.s32.totalorder %s943_s21, 4   ;;  %s1197_s15 = smov %s879_s16 }
 0x1cd   : > { %s1198_s16 = smov %s883_s17  ;;  %s1199_s17 = smov %s955_s24 }
 0x1ce   : > { %s1200_s18 = smov %s943_s21  ;;  %22 = sbr.rel (!%p20_p8) target bundleno = 7 (0x7), region = 108 }
 0x1d5   :  { %526 = vsyncpa [#allocation3], 1 }
 0x1d6   :  { %528 = vsyncpa [#allocation3 + $0x1], 1 }
 0x1d7   :  { %529 = vsyncpa [#allocation6], 1 }
 0x1d8   :  { %531 = vsyncpa [#allocation6 + $0x1], 1 }
 0x1d9   :  { %532 = vsyncpa [#allocation4], 1 }
 0x1da   :  { %534 = vsyncpa [#allocation4 + $0x1], 1 }

</bundles_post_ra>
